<compile_context>
chip_gen: v7x
topology: tpu7x:2x2x1
jax: 0.10.0
libtpu: 0.0.40
codegen_flags: <defaults>
</compile_context>

<pallas_src>
import functools

import jax
import jax.numpy as jnp
from jax.experimental import pallas as pl
from jax.experimental.pallas import tpu as pltpu


def _layernorm2d_kernel(x_ref, w_ref, b_ref, o_ref, *, eps, inv_n, valid_cols):
    # x_ref: (tile_rows, Hp)   w_ref/b_ref: (1, Hp)
    xf = x_ref[...].astype(jnp.float32)

    # Row-wise mean (lane-axis reduction -> XLU), f32 accumulation; the
    # division is a precomputed 1/H multiply.
    mean = jnp.sum(xf, axis=-1, keepdims=True) * inv_n

    centered = xf - mean
    if valid_cols is not None:
        # Lane padding present: zero padded columns so they do not pollute Var.
        col = jax.lax.broadcasted_iota(jnp.int32, xf.shape, dimension=1)
        centered = jnp.where(col < valid_cols, centered, 0.0)

    # Two-pass variance: robust vs E[x^2]-E[x]^2 cancellation.
    var = jnp.sum(centered * centered, axis=-1, keepdims=True) * inv_n
    inv_std = jax.lax.rsqrt(var + eps)  # EUP

    w = w_ref[...].astype(jnp.float32)
    b = b_ref[...].astype(jnp.float32)

    # torch.addcmul(bias, scale, y) == bias + scale * y
    o_ref[...] = (centered * inv_std * w + b).astype(o_ref.dtype)


def _round_up(x, m):
    return ((x + m - 1) // m) * m


def _tpu_vmem_capacity_bytes():
    cap = 64 * 2**20  # conservative default = v7x per-TensorCore VMEM
    try:
        info = pltpu.get_tpu_info()
        cap = int(getattr(info, "vmem_capacity_bytes", cap))
    except Exception:
        pass
    return cap


def _pick_tile_rows(rows, H, itemsize, vmem_cap):
    """Byte-targeted, sublane-aligned row tile with VMEM + pipelining awareness."""
    # Sublane packing: 8 rows for 32-bit, 16 for bf16, 32 for 8-bit dtypes.
    sublane = max(8, 32 // itemsize)
    rows_al = _round_up(rows, sublane)

    # Target ~8 MiB of input DMA per block (>=2-4 MiB reaches 85%+ of roofline;
    # per-grid-step overhead is ~0.35 us so small blocks waste bandwidth).
    target_in_bytes = 8 * 1024 * 1024
    tile_target = max(
        sublane, (target_in_bytes // max(1, H * itemsize)) // sublane * sublane
    )

    # Per-row VMEM footprint: double-buffered in + out DMA tiles plus ~1.5x
    # f32 compute temporaries (xf / centered).  Keep within the chip budget.
    budget = max(16 * 2**20, min(vmem_cap - 16 * 2**20, 96 * 2**20))
    per_row = 2 * 2 * H * itemsize + (3 * H * 4) // 2
    tile_vmem = max(sublane, (budget // per_row) // sublane * sublane)

    tile = min(tile_target, tile_vmem, rows_al)

    # Prefer >= 4 grid steps (>= 2 per v7x TensorCore) so the software pipeline
    # always has a tile in flight on each core.
    min_steps = 4
    if pl.cdiv(rows_al, tile) < min_steps:
        desired = _round_up(pl.cdiv(rows_al, min_steps), sublane)
        tile = min(tile, max(sublane, desired))
    return tile


def layernorm2d(x, weight, bias=None, *, eps=1e-5, tile_rows=None):
    """x: [..., H] ; weight, bias: [H].  Returns layer-normed x (same shape/dtype)."""
    orig_shape = x.shape
    H = int(orig_shape[-1])
    rows = 1
    for d in orig_shape[:-1]:
        rows *= int(d)

    itemsize = jnp.dtype(x.dtype).itemsize
    vmem_cap = _tpu_vmem_capacity_bytes()
    if tile_rows is None:
        tile_rows = _pick_tile_rows(rows, H, itemsize, vmem_cap)

    # Lane-dense padding of the normalized axis (only when H % 128 != 0): zero
    # columns do not change sum(x) and are masked out of Var inside the kernel.
    Hp = _round_up(H, 128)
    x2 = x.reshape(rows, H)
    if bias is None:
        bias = jnp.zeros((H,), dtype=weight.dtype)
    w2 = weight.reshape(1, H)
    b2 = bias.reshape(1, H)
    if Hp != H:
        x2 = jnp.pad(x2, ((0, 0), (0, Hp - H)))
        w2 = jnp.pad(w2, ((0, 0), (0, Hp - H)))
        b2 = jnp.pad(b2, ((0, 0), (0, Hp - H)))

    kernel = functools.partial(
        _layernorm2d_kernel,
        eps=float(eps),
        inv_n=1.0 / float(H),
        valid_cols=None if Hp == H else H,
    )

    # VMEM accounting: double-buffered in/out DMA tiles + f32 temporaries +
    # the (tiny) weight/bias blocks, clamped below the chip's physical VMEM.
    needed = (
        2 * 2 * tile_rows * Hp * itemsize
        + (3 * tile_rows * Hp * 4) // 2
        + 2 * 2 * Hp * 4
    )
    vmem_limit = int(
        min(vmem_cap - 4 * 2**20, max(32 * 2**20, needed + 8 * 2**20))
    )

    grid = (pl.cdiv(rows, tile_rows),)
    out = pl.pallas_call(
        kernel,
        out_shape=jax.ShapeDtypeStruct((rows, Hp), x.dtype),
        grid_spec=pltpu.PrefetchScalarGridSpec(
            num_scalar_prefetch=0,
            grid=grid,
            in_specs=[
                pl.BlockSpec((tile_rows, Hp), lambda i: (i, 0)),
                pl.BlockSpec((1, Hp), lambda i: (0, 0)),
                pl.BlockSpec((1, Hp), lambda i: (0, 0)),
            ],
            out_specs=pl.BlockSpec((tile_rows, Hp), lambda i: (i, 0)),
        ),
        compiler_params=pltpu.CompilerParams(
            dimension_semantics=("parallel",),
            vmem_limit_bytes=vmem_limit,
        ),
    )(x2, w2, b2)

    if Hp != H:
        out = out[:, :H]
    return out.reshape(orig_shape)


def _reference(x, weight, bias, eps):
    xf = x.astype(jnp.float32)
    mean = jnp.mean(xf, axis=-1, keepdims=True)
    var = jnp.mean((xf - mean) * (xf - mean), axis=-1, keepdims=True)
    y = (xf - mean) * jax.lax.rsqrt(var + eps)
    return (y * weight.astype(jnp.float32) + bias.astype(jnp.float32)).astype(x.dtype)


if __name__ == "__main__":
    eps = 1e-5
    key = jax.random.PRNGKey(0)

    # Case 1: nicely tiled shape (normalized_shape = 128, summa_dim = 1).
    batch, seq, hidden = 2, 8, 128
    k1, k2 = jax.random.split(key)
    x = jax.random.normal(k1, (batch, seq, hidden), dtype=jnp.float32)
    weight = jnp.ones((hidden,), dtype=jnp.float32)
    bias = jnp.zeros((hidden,), dtype=jnp.float32)

    out = jax.block_until_ready(layernorm2d(x, weight, bias, eps=eps))
    ref = _reference(x, weight, bias, eps)
    assert out.shape == x.shape and out.dtype == x.dtype
    assert jnp.allclose(out, ref, atol=1e-4, rtol=1e-4)

    # Case 2: row count not divisible by the tile (exercises the partial edge
    # block handled in-kernel, no wrapper pad/slice) with non-trivial affine.
    b2_, s2_, h2_ = 3, 5, 256
    k3, k4, k5 = jax.random.split(k2, 3)
    x2 = jax.random.normal(k3, (b2_, s2_, h2_), dtype=jnp.float32)
    w2 = 1.0 + 0.1 * jax.random.normal(k4, (h2_,), dtype=jnp.float32)
    bb2 = 0.1 * jax.random.normal(k5, (h2_,), dtype=jnp.float32)

    out2 = jax.block_until_ready(layernorm2d(x2, w2, bb2, eps=eps))
    ref2 = _reference(x2, w2, bb2, eps)
    assert out2.shape == x2.shape and out2.dtype == x2.dtype
    assert jnp.allclose(out2, ref2, atol=1e-4, rtol=1e-4)

    # Case 3: H not a multiple of 128 (exercises the lane-padding + in-kernel
    # variance masking path).
    b3_, s3_, h3_ = 2, 4, 96
    k6, k7, k8 = jax.random.split(k5, 3)
    x3 = 3.0 + jax.random.normal(k6, (b3_, s3_, h3_), dtype=jnp.float32)
    w3 = 1.0 + 0.1 * jax.random.normal(k7, (h3_,), dtype=jnp.float32)
    bb3 = 0.1 * jax.random.normal(k8, (h3_,), dtype=jnp.float32)

    out3 = jax.block_until_ready(layernorm2d(x3, w3, bb3, eps=eps))
    ref3 = _reference(x3, w3, bb3, eps)
    assert out3.shape == x3.shape and out3.dtype == x3.dtype
    assert jnp.allclose(out3, ref3, atol=1e-4, rtol=1e-4)

    print("KERNEL_OK")
</pallas_src>

<mosaic_0001>
module attributes {stable_mosaic.version = 11 : i64} {
  func.func @_layernorm2d_kernel(%arg0: i32, %arg1: memref<8x128xf32, #tpu.memory_space<vmem>>, %arg2: memref<1x128xf32, #tpu.memory_space<vmem>>, %arg3: memref<1x128xf32, #tpu.memory_space<vmem>>, %arg4: memref<8x128xf32, #tpu.memory_space<vmem>>) attributes {dimension_semantics = [#tpu.dimension_semantics<parallel>], iteration_bounds = array<i64: 2>, scalar_prefetch = 0 : i64, scratch_operands = 0 : i64, tpu.core_type = #tpu.core_type<tc>, window_params = [{transform_indices = @transform_0, window_bounds = array<i64: 8, 128>}, {pipeline_mode = #tpu.pipeline_mode<synchronous>, transform_indices = @transform_1, window_bounds = array<i64: 1, 128>}, {pipeline_mode = #tpu.pipeline_mode<synchronous>, transform_indices = @transform_2, window_bounds = array<i64: 1, 128>}, {transform_indices = @transform_3, window_bounds = array<i64: 8, 128>}]} {
    %c0 = arith.constant 0 : index
    %c0_0 = arith.constant 0 : index
    %0 = vector.load %arg1[%c0, %c0_0] : memref<8x128xf32, #tpu.memory_space<vmem>>, vector<8x128xf32>
    %cst = arith.constant dense<0.000000e+00> : vector<8xf32>
    %1 = vector.multi_reduction <add>, %0, %cst [1] : vector<8x128xf32> to vector<8xf32>
    %2 = vector.shape_cast %1 : vector<8xf32> to vector<8x1xf32>
    %cst_1 = arith.constant 7.812500e-03 : f32
    %3 = vector.broadcast %cst_1 : f32 to vector<8x1xf32>
    %4 = arith.mulf %2, %3 : vector<8x1xf32>
    %5 = vector.broadcast %4 : vector<8x1xf32> to vector<8x128xf32>
    %6 = arith.subf %0, %5 : vector<8x128xf32>
    %7 = arith.mulf %6, %6 : vector<8x128xf32>
    %cst_2 = arith.constant dense<0.000000e+00> : vector<8xf32>
    %8 = vector.multi_reduction <add>, %7, %cst_2 [1] : vector<8x128xf32> to vector<8xf32>
    %9 = vector.shape_cast %8 : vector<8xf32> to vector<8x1xf32>
    %cst_3 = arith.constant 7.812500e-03 : f32
    %10 = vector.broadcast %cst_3 : f32 to vector<8x1xf32>
    %11 = arith.mulf %9, %10 : vector<8x1xf32>
    %cst_4 = arith.constant 9.99999974E-6 : f32
    %12 = vector.broadcast %cst_4 : f32 to vector<8x1xf32>
    %13 = arith.addf %11, %12 : vector<8x1xf32>
    %14 = math.rsqrt %13 : vector<8x1xf32>
    %c0_5 = arith.constant 0 : index
    %c0_6 = arith.constant 0 : index
    %15 = vector.load %arg2[%c0_5, %c0_6] : memref<1x128xf32, #tpu.memory_space<vmem>>, vector<1x128xf32>
    %c0_7 = arith.constant 0 : index
    %c0_8 = arith.constant 0 : index
    %16 = vector.load %arg3[%c0_7, %c0_8] : memref<1x128xf32, #tpu.memory_space<vmem>>, vector<1x128xf32>
    %17 = vector.broadcast %14 : vector<8x1xf32> to vector<8x128xf32>
    %18 = arith.mulf %6, %17 : vector<8x128xf32>
    %19 = vector.broadcast %15 : vector<1x128xf32> to vector<8x128xf32>
    %20 = arith.mulf %18, %19 : vector<8x128xf32>
    %21 = vector.broadcast %16 : vector<1x128xf32> to vector<8x128xf32>
    %22 = arith.addf %20, %21 : vector<8x128xf32>
    %c0_9 = arith.constant 0 : index
    %c0_10 = arith.constant 0 : index
    %23 = vector.load %arg4[%c0_9, %c0_10] : memref<8x128xf32, #tpu.memory_space<vmem>>, vector<8x128xf32>
    tpu.vector_store %arg4[%c0_9, %c0_10], %22 {strides = array<i32>} : memref<8x128xf32, #tpu.memory_space<vmem>>, vector<8x128xf32>,
    return
  }
  func.func @transform_0(%arg0: i32) -> (i32, i32) {
    %c0_i32 = arith.constant 0 : i32
    %c0_i32_0 = arith.constant 0 : i32
    return %arg0, %c0_i32 : i32, i32
  }
  func.func @transform_1(%arg0: i32) -> (i32, i32) {
    %c0_i32 = arith.constant 0 : i32
    %c0_i32_0 = arith.constant 0 : i32
    %c0_i32_1 = arith.constant 0 : i32
    return %c0_i32, %c0_i32_0 : i32, i32
  }
  func.func @transform_2(%arg0: i32) -> (i32, i32) {
    %c0_i32 = arith.constant 0 : i32
    %c0_i32_0 = arith.constant 0 : i32
    %c0_i32_1 = arith.constant 0 : i32
    return %c0_i32, %c0_i32_0 : i32, i32
  }
  func.func @transform_3(%arg0: i32) -> (i32, i32) {
    %c0_i32 = arith.constant 0 : i32
    %c0_i32_0 = arith.constant 0 : i32
    return %arg0, %c0_i32 : i32, i32
  }
}

</mosaic_0001>

<bundles_post_ra>
// kernel: tpu_custom_call.1
= control target key start
LH: loop header
LB: loop body
LE: loop exit
PB: predicated region body
PF: predicated region fallthrough
CT: control target
= control target key end

     0   :  { %8 = vsyncpa [#allocation3], 0  ;;  %s648_s0 = inlined_call_operand.hbm [shape: f32[16,128], index: 0, kind: input, shape index: {}]   ;;  %s649_s1 = inlined_call_operand.vmem [shape: f32[1,128], index: 1, kind: input, shape index: {}]   ;;  %s650_s2 = inlined_call_operand.vmem [shape: f32[1,128], index: 2, kind: input, shape index: {}]   ;;  %s651_s3 = inlined_call_operand.hbm [shape: f32[16,128], index: 3, kind: output, shape index: {}]  }
   0x1   :  { %10 = vsyncpa [#allocation3 + $0x1], 0 }
   0x2   :  { %11 = vsyncpa [#allocation4], 0 }
   0x3   :  { %13 = vsyncpa [#allocation4 + $0x1], 0  ;;  %s481_s12 = smov 0   ;;  %s483_s13 = smov 0  }
   0x4   :  { %s485_s14 = smov 0   ;;  %s487_s15 = smov 0  }
   0x5 LB: > { %s502_s16 = sadd.s32 4294967295, %s457_s15   ;;  %s299_s17 = sadd.s32 4294967294, %s457_s15   ;;  %s457_s15 = sphi %s487_s15, %s666_s15   ;;  %s453_s14 = sphi %s485_s14, %s665_s14   ;;  %s449_s13 = sphi %s483_s13, %s664_s13   ;;  %s445_s12 = sphi %s481_s12, %s663_s12  }
   0x6   : > { %s506_s18 = sadd.s32 1, %s457_s15   ;;  %s26_s19 = sadd.s32 1, %s453_s14 }
   0x7   : > { %s23_s20 = ssub.s32 %s457_s15, %s506_s18  ;;  %p33_p0 = scmp.ne.s32.totalorder %s453_s14, %s449_s13 }
   0x8   : > { %p24_p1 = scmp.eq.s32.totalorder %s23_s20, 0  ;;  %p34_p2 = scmp.eq.s32.totalorder %s457_s15, 0 }
   0x9   : > { %p39_p3 = scmp.ne.s32.totalorder %s449_s13, %s445_s12  ;;  %p40_p4 = scmp.eq.s32.totalorder %s502_s16, 0 }
   0xa   : > { %s518_s21 = scalar_select %p24_p1, %s453_s14, %s26_s19  }
   0xb   : > { %p520_p5 = por %p34_p2, %p33_p0  ;;  %p524_p6 = por %p40_p4, %p39_p3 }
   0xc   : > { %p105_p7 = scmp.eq.s32.totalorder %s502_s16, 1  ;;  %p111_p8 = scmp.eq.s32.totalorder %s299_s17, 1 }
   0xd   : > { %p325_p10 = scmp.lt.s32.totalorder %s457_s15, 2  ;;  %s137_s26 = sand.u32 1, %s453_s14  }
   0xe   : > { %p531_p11 = por %p105_p7, %p33_p0  ;;  %p535_p12 = por %p111_p8, %p39_p3 }
   0xf   : > { %s303_s27 = sshll.u32 %s457_s15, 7  ;;  %s302_s28 = sshll.u32 %s137_s26, 3 }
  0x10   : > { %s655_s24 = scalar_select %p531_p11, 1, 0 }
  0x11   : > { %s656_s25 = scalar_select %p535_p12, 1, 0 }
  0x12   : > { %s544_s4 = scalar_lea.hbm %s648_s0, %s303_s27  ;;  %s141_s5 = scalar_lea.vmem [#allocation2], %s302_s28 }
  0x13   : > { %s148_s6 = sshll.u32 %s141_s5, 4  ;;  %p548_p13 = pnand %p325_p10, %p520_p5  ;;  %s552_s6 = int_to_ptr.vmem [resolvable:$true] %s148_s6 }
  0x14   : > { %s138_s8 = scalar_lea.sflag [#allocation3], %s137_s26  ;;  %s361_s9 = scalar_lea.hbm %s544_s4, 128 }
  0x15   : > { %p362_p2 = scmp.ne.s32.totalorder %s544_s4, %s361_s9  ;;  %p363_p3 = pneg %p548_p13 }
  0x16   : > { %s366_s17 = scalar_lea.hbm %s648_s0, 256  ;;  %p367_p5 = scmp.lt.u32.totalorder %s544_s4, %s648_s0 }
  0x17   : > { %p364_p4 = pnand %p363_p3, %p362_p2  ;;  %p368_p8 = scmp.lt.u32.totalorder %s366_s17, %s361_s9 }
  0x18   : > { %p370_p9 = scmp.lt.u32.totalorder %s361_s9, %s544_s4 }
  0x19   : > { %p365_p7 = pneg %p364_p4  ;;  %p369_p10 = por %p368_p8, %p367_p5 }
  0x1b   : > { %p371_p0 = por %p370_p9, %p369_p10 }
  0x1d   : > { %p372_p1 = pnand %p371_p0, %p365_p7 }
  0x1f   : > { %375 = shalt.err (!%p372_p1)
}
  0x20   : > { %s376_s22 = scalar_lea.vmem %s552_s6, 128  ;;  %s459_s26 = smov [#allocation2]  }
  0x21   : > { %p377_p2 = scmp.ne.s32.totalorder %s552_s6, %s376_s22  ;;  %s381_s27 = sshll.u32 %s459_s26, 4  ;;  %s382_s27 = int_to_ptr.vmem [resolvable:$false] %s381_s27 }
  0x22   : > { %s383_s28 = scalar_lea.vmem %s382_s27, 256  ;;  %p384_p11 = scmp.lt.s32.totalorder %s552_s6, %s382_s27 }
  0x23   : > { %p379_p4 = pnand %p377_p2, %p363_p3  ;;  %p385_p5 = scmp.lt.s32.totalorder %s383_s28, %s376_s22 }
  0x25   : > { %p380_p12 = pneg %p379_p4  ;;  %p386_p8 = por %p385_p5, %p384_p11 }
  0x27   : > { %p387_p9 = pnand %p386_p8, %p380_p12 }
  0x29   : > { %390 = shalt.err (!%p387_p9)
}
  0x2a   : > { %320 = dma.hbm_to_vmem [thread:$0]  (!%p548_p13), %s544_s4, 128, %s552_s6, %s138_s8  }
  0x2b   : > { %p658_p0 = scmp.lt.s32.totalorder %s457_s15, 3  ;;  %p659_p1 = scmp.ge.s32.totalorder %s457_s15, 1 }
  0x2d   : > { %p154_p3 = pnand %p659_p1, %p658_p0 }
  0x2e   : > { %s586_s29 = sand.u32 (!%p154_p3), 1, %s449_s13  }
  0x2f   : > { %157 = sbr.rel (%p154_p3) target bundleno = 381 (0x17d), region = 32  ;;  %s305_s30 = sshll.u32 (!%p154_p3), %s586_s29, 3 }
  0x30   : > { %s160_s5 = scalar_lea.sflag (!%p154_p3), [#allocation3], %s586_s29  ;;  %s163_s9 = scalar_lea.vmem (!%p154_p3), [#allocation2], %s305_s30 }
  0x36   : > { %436 = dma.done.wait (%p524_p6), %s160_s5, 128  }
  0x37   : > { %438 = vsyncadd (%p524_p6), %s160_s5, 4294967168  ;;  %v186_v0 = vld [vmem:[%s163_s9] sm:$0xff]  ;;  %s310_s8 = sshll.u32 %s502_s16, 7  ;;  %s185_s10 = scalar_lea.vmem [#allocation5], %s305_s30 }
  0x38   : > { %187 = vadd.xlane.f32.xlu0 %v186_v0  ;;  %v307_v9 = vld [vmem:[%s649_s1] ss:$0 sm:$0xff]  ;;  %s229_s11 = sshll.u32 %s185_s10, 4  ;;  %s604_s20 = scalar_lea.hbm %s651_s3, %s310_s8  ;;  %s606_s11 = int_to_ptr.vmem [resolvable:$true] %s229_s11 }
  0x39   : > { %v308_v11 = vld [vmem:[%s650_s2] ss:$0 sm:$0xff]  ;;  %s216_s22 = scalar_lea.sflag [#allocation4], %s586_s29  ;;  %s391_s26 = scalar_lea.vmem %s606_s11, 128 }
  0x3a   : > { %p392_p6 = scmp.ne.s32.totalorder %s606_s11, %s391_s26  ;;  %p660_p11 = scmp.ne.s32.totalorder %s655_s24, 0 }
  0x3b   : > { %s460_s16 = smov [#allocation5]  }
  0x3c   : > { %p393_p12 = pnand %p392_p6, %p660_p11  ;;  %s395_s27 = sshll.u32 %s460_s16, 4  ;;  %s396_s27 = int_to_ptr.vmem [resolvable:$false] %s395_s27 }
  0x3d   : > { %s397_s28 = scalar_lea.vmem %s396_s27, 256  ;;  %p398_p7 = scmp.lt.s32.totalorder %s606_s11, %s396_s27 }
  0x3e   : > { %p394_p13 = pneg %p393_p12  ;;  %p399_p10 = scmp.lt.s32.totalorder %s397_s28, %s391_s26 }
  0x40   : > { %p400_p2 = por %p399_p10, %p398_p7 }
  0x42   : > { %p401_p4 = pnand %p400_p2, %p394_p13 }
  0xc5   : > { %v188_v1 = vpop.xlane.xlu0 %187 }
  0xc6   : > { %v189_v2 = vmul.f32 0.0078125, %v188_v1 }
  0xc8   : > { %v190_v3 = vsub.f32 %v186_v0, %v189_v2 }
  0xca   : > { %v191_v4 = vmul.f32 %v190_v3, %v190_v3 }
  0xcc   : > { %192 = vadd.xlane.f32.xlu0 %v191_v4 }
 0x159   : > { %v193_v5 = vpop.xlane.xlu0 %192 }
 0x15a   : > { %v194_v6 = vmul.f32 0.0078125, %v193_v5 }
 0x15c   : > { %v195_v7 = vadd.f32 1e-05, %v194_v6 }
 0x15e   : > { %359 = vrsqrt.f32 %v195_v7 }
 0x168   : > { %v360_v8 = vpop.eup %359 }
 0x169   : > { %v199_v10 = vmul.f32 %v360_v8, %v190_v3 }
 0x16b   : > { %v206_v12 = vmul.f32 %v307_v9, %v199_v10 }
 0x16d   : > { %v213_v13 = vadd.f32 %v308_v11, %v206_v12 }
 0x16f   : > { %214 = vst [vmem:[%s185_s10] sm:$0xff] %v213_v13 }
 0x170   : > { %404 = shalt.err (!%p401_p4)
}
 0x171   : > { %s405_s29 = scalar_lea.hbm %s604_s20, 128  ;;  %s409_s9 = scalar_lea.hbm %s651_s3, 256 }
 0x172   : > { %p406_p5 = scmp.ne.s32.totalorder %s604_s20, %s405_s29  ;;  %p410_p0 = scmp.lt.u32.totalorder %s604_s20, %s651_s3 }
 0x173   : > { %p411_p1 = scmp.lt.u32.totalorder %s409_s9, %s405_s29  ;;  %p413_p6 = scmp.lt.u32.totalorder %s405_s29, %s604_s20 }
 0x174   : > { %p407_p8 = pnand %p406_p5, %p660_p11 }
 0x175   : > { %p412_p3 = por %p411_p1, %p410_p0 }
 0x176   : > { %p408_p9 = pneg %p407_p8 }
 0x177   : > { %p414_p12 = por %p413_p6, %p412_p3 }
 0x179   : > { %p415_p13 = pnand %p414_p12, %p408_p9 }
 0x17b   : > { %418 = shalt.err (!%p415_p13)
}
 0x17c   : > { %315 = dma.vmem_to_hbm [thread:$0]  (%p660_p11), %s606_s11, 128, %s604_s20, %s216_s22  }
 0x17d PF: > { %s241_s23 = sand.u32 1, %s445_s12   ;;  %p661_p7 = scmp.ne.s32.totalorder %s656_s25, 0 }
 0x17e   : > { %p662_p10 = scmp.ge.s32.totalorder %s457_s15, 2  ;;  %s242_s7 = scalar_lea.sflag [#allocation4], %s241_s23 }
 0x180   : > { %p322_p2 = pnand %p662_p10, %p661_p7 }
 0x182   : > { %440 = dma.done.wait (!%p322_p2), %s242_s7, 128  }
 0x183   : > { %442 = vsyncadd (!%p322_p2), %s242_s7, 4294967168  ;;  %p16_p4 = scmp.ge.s32.totalorder %s506_s18, 4   ;;  %s663_s12 = smov %s449_s13 }
 0x184   : > { %s664_s13 = smov %s453_s14  ;;  %s665_s14 = smov %s518_s21 }
 0x185   : > { %s666_s15 = smov %s506_s18  ;;  %18 = sbr.rel (!%p16_p4) target bundleno = 5 (0x5), region = 77 }
 0x18c   :  { %247 = vsyncpa [#allocation3], 1 }
 0x18d   :  { %249 = vsyncpa [#allocation3 + $0x1], 1 }
 0x18e   :  { %250 = vsyncpa [#allocation4], 1 }
 0x18f   :  { %252 = vsyncpa [#allocation4 + $0x1], 1 }

</bundles_post_ra>
